<compile_context>
chip_gen: v7x
topology: tpu7x:2x2x1
jax: 0.10.0
libtpu: 0.0.40
codegen_flags: <defaults>
</compile_context>

<pallas_src>
import functools

import jax
import jax.numpy as jnp
from jax import lax
from jax.experimental import pallas as pl
from jax.experimental.pallas import tpu as pltpu


def _tv_kernel(x_ref, out_ref, acc_v_ref, acc_h_ref, *,
               w, nc, tile_nc, inner_steps, needs_plane_mask):
    # x_ref:   (tile_nc, hw) block of flattened planes (hw = H*W, lane-dense).
    # out_ref: (1, 8, 128) partial-sum block for this split, written last step.
    # acc_*:   f32 VMEM scratch, elementwise accumulators resident per split.
    p = pl.program_id(0)   # split ("parallel") index
    j = pl.program_id(1)   # streaming step over plane blocks ("arbitrary")

    @pl.when(j == 0)
    def _init():
        acc_v_ref[...] = jnp.zeros_like(acc_v_ref)
        acc_h_ref[...] = jnp.zeros_like(acc_h_ref)

    x = x_ref[...].astype(jnp.float32)
    t, hw = x.shape

    # Mask planes that belong to grid padding (partial last block and/or
    # phantom blocks from the 2-way split). Statically off when exact.
    if needs_plane_mask:
        g = p * inner_steps + j                    # un-clamped global block id
        plane = g * tile_nc + lax.broadcasted_iota(jnp.int32, (t, 1), 0)
        plane_ok = plane < nc
    else:
        plane_ok = None

    if hw > 1:
        # Width diffs ("v_tv"): x[k+1] - x[k] on the flat plane. Pairs where k
        # is the last column of a row cross the row boundary -> mask them out.
        d_v = x[:, 1:] - x[:, :hw - 1]
        col = lax.broadcasted_iota(jnp.int32, (1, hw - 1), 1)
        sq_v = jnp.where((col % w) != (w - 1), d_v * d_v, 0.0)
        if plane_ok is not None:
            sq_v = jnp.where(plane_ok, sq_v, 0.0)
        acc_v_ref[...] += sq_v

    if hw > w:
        # Height diffs ("h_tv"): x[k+W] - x[k] is always the same-column pair
        # one row down for k < (H-1)*W -- no mask needed.
        d_h = x[:, w:] - x[:, :hw - w]
        sq_h = d_h * d_h
        if plane_ok is not None:
            sq_h = jnp.where(plane_ok, sq_h, 0.0)
        acc_h_ref[...] += sq_h

    # Single cross-lane reduce, deferred to the last step of this split.
    @pl.when(j == inner_steps - 1)
    def _finalize():
        total = jnp.sum(acc_v_ref[...]) + jnp.sum(acc_h_ref[...])
        out_ref[...] = jnp.full(out_ref.shape, total, dtype=jnp.float32)


def total_variation_loss(x, *, target_block_bytes=2 * 1024 * 1024):
    """x: (N, C, H, W). Returns scalar = (h_tv + v_tv) / (N*C*H*W) * 0.1."""
    n, c, h, w = x.shape
    nc = n * c
    hw = h * w

    # Lane-dense view: one (H*W)-long row per (batch, channel) plane.
    x_flat = x.reshape(nc, hw)

    # Planes per grid step from a VMEM byte budget; keep the second-minor
    # block dim a multiple of 8 (or equal to the full dim).
    itemsize = jnp.dtype(x.dtype).itemsize
    tile_nc = max(1, target_block_bytes // (hw * itemsize))
    tile_nc = 8 if tile_nc < 8 else tile_nc - tile_nc % 8
    tile_nc = min(tile_nc, nc)
    # TODO(synk): planes so large that 8 rows overflow VMEM would need an
    # additional lane-dim tiling pass; not needed at these shapes.

    nblocks = pl.cdiv(nc, tile_nc)
    # Split the block stream across (up to) two TensorCores (v7x megacore);
    # on single-core chips the leading axis is a short serial outer loop.
    num_splits = 2 if nblocks >= 2 else 1
    inner_steps = pl.cdiv(nblocks, num_splits)
    needs_plane_mask = (num_splits * inner_steps * tile_nc) != nc

    kernel = functools.partial(
        _tv_kernel, w=w, nc=nc, tile_nc=tile_nc, inner_steps=inner_steps,
        needs_plane_mask=needs_plane_mask)

    # Clamp phantom block ids (from split padding) to the last real block;
    # the in-kernel plane mask zeroes their contribution.
    def x_index_map(p, j):
        return (jnp.minimum(p * inner_steps + j, nblocks - 1), 0)

    # VMEM: 2 double-buffered input blocks + 2 f32 accumulators (+ slack).
    vmem_needed = (2 * tile_nc * hw * itemsize
                   + 2 * tile_nc * hw * 4
                   + (8 << 20))
    # Clamp to <= 48 MiB so the limit is valid even on v7x (64 MiB physical).
    vmem_limit = int(min(max(vmem_needed, 16 << 20), 48 << 20))

    partials = pl.pallas_call(
        kernel,
        out_shape=jax.ShapeDtypeStruct((num_splits, 8, 128), jnp.float32),
        grid_spec=pltpu.PrefetchScalarGridSpec(
            num_scalar_prefetch=0,
            grid=(num_splits, inner_steps),
            in_specs=[pl.BlockSpec((tile_nc, hw), x_index_map)],
            out_specs=pl.BlockSpec((1, 8, 128), lambda p, j: (p, 0, 0)),
            scratch_shapes=[
                pltpu.VMEM((tile_nc, max(hw - 1, 1)), jnp.float32),
                pltpu.VMEM((tile_nc, max(hw - w, 1)), jnp.float32),
            ],
        ),
        compiler_params=pltpu.CompilerParams(
            dimension_semantics=("parallel", "arbitrary"),
            vmem_limit_bytes=vmem_limit,
        ),
    )(x_flat)

    tv_sum = jnp.sum(partials[:, 0, 0])
    denom = jnp.float32(n * c * h * w)
    return (tv_sum / denom) * jnp.float32(0.1)


def total_variation_loss_ref(x):
    x = x.astype(jnp.float32)
    n, c, h, w = x.shape
    h_tv = jnp.sum((x[:, :, 1:, :] - x[:, :, :-1, :]) ** 2)
    v_tv = jnp.sum((x[:, :, :, 1:] - x[:, :, :, :-1]) ** 2)
    return (h_tv + v_tv) / (n * c * h * w) * 0.1


if __name__ == "__main__":
    key = jax.random.PRNGKey(0)
    x = jax.random.normal(key, (2, 4, 16, 16), dtype=jnp.float32)

    out = jax.block_until_ready(total_variation_loss(x))
    ref = jax.block_until_ready(total_variation_loss_ref(x))

    assert jnp.allclose(out, ref, rtol=1e-5, atol=1e-5), (out, ref)
    print("KERNEL_OK")
</pallas_src>

<mosaic_0001>
module attributes {stable_mosaic.version = 11 : i64} {
  func.func @_tv_kernel(%arg0: i32, %arg1: i32, %arg2: memref<8x256xf32, #tpu.memory_space<vmem>>, %arg3: memref<1x8x128xf32, #tpu.memory_space<vmem>>, %arg4: memref<8x255xf32, #tpu.memory_space<vmem>>, %arg5: memref<8x240xf32, #tpu.memory_space<vmem>>) attributes {dimension_semantics = [#tpu.dimension_semantics<parallel>, #tpu.dimension_semantics<arbitrary>], iteration_bounds = array<i64: 1, 1>, scalar_prefetch = 0 : i64, scratch_operands = 2 : i64, tpu.core_type = #tpu.core_type<tc>, window_params = [{transform_indices = @transform_0, window_bounds = array<i64: 8, 256>}, {transform_indices = @transform_1, window_bounds = array<i64: 1, 8, 128>}]} {
    %c0_i32 = arith.constant 0 : i32
    %0 = arith.cmpi eq, %arg1, %c0_i32 : i32
    %1 = arith.extui %0 : i1 to i32
    %c0_i32_0 = arith.constant 0 : i32
    %2 = arith.cmpi ne, %1, %c0_i32_0 : i32
    scf.if %2 {
      %cst_16 = arith.constant 0.000000e+00 : f32
      %44 = vector.broadcast %cst_16 : f32 to vector<8x255xf32>
      %c0_17 = arith.constant 0 : index
      %c0_18 = arith.constant 0 : index
      %45 = vector.load %arg4[%c0_17, %c0_18] : memref<8x255xf32, #tpu.memory_space<vmem>>, vector<8x255xf32>
      tpu.vector_store %arg4[%c0_17, %c0_18], %44 {strides = array<i32>} : memref<8x255xf32, #tpu.memory_space<vmem>>, vector<8x255xf32>,
      %cst_19 = arith.constant 0.000000e+00 : f32
      %46 = vector.broadcast %cst_19 : f32 to vector<8x240xf32>
      %c0_20 = arith.constant 0 : index
      %c0_21 = arith.constant 0 : index
      %47 = vector.load %arg5[%c0_20, %c0_21] : memref<8x240xf32, #tpu.memory_space<vmem>>, vector<8x240xf32>
      tpu.vector_store %arg5[%c0_20, %c0_21], %46 {strides = array<i32>} : memref<8x240xf32, #tpu.memory_space<vmem>>, vector<8x240xf32>,
    } else {
    }
    %c0 = arith.constant 0 : index
    %c0_1 = arith.constant 0 : index
    %3 = vector.load %arg2[%c0, %c0_1] : memref<8x256xf32, #tpu.memory_space<vmem>>, vector<8x256xf32>
    %4 = vector.extract_strided_slice %3 {offsets = [0, 1], sizes = [8, 255], strides = [1, 1]} : vector<8x256xf32> to vector<8x255xf32>
    %5 = vector.extract_strided_slice %3 {offsets = [0, 0], sizes = [8, 255], strides = [1, 1]} : vector<8x256xf32> to vector<8x255xf32>
    %6 = arith.subf %4, %5 : vector<8x255xf32>
    %7 = tpu.iota {dimensions = array<i32: 1>} : vector<1x255xi32>
    %c16_i32 = arith.constant 16 : i32
    %c0_i32_2 = arith.constant 0 : i32
    %8 = arith.cmpi eq, %c16_i32, %c0_i32_2 : i32
    %c1_i32 = arith.constant 1 : i32
    %9 = arith.select %8, %c1_i32, %c16_i32 : i32
    %10 = vector.broadcast %9 : i32 to vector<1x255xi32>
    %11 = arith.remsi %7, %10 : vector<1x255xi32>
    %c0_i32_3 = arith.constant 0 : i32
    %12 = vector.broadcast %c0_i32_3 : i32 to vector<1x255xi32>
    %13 = arith.cmpi ne, %11, %12 : vector<1x255xi32>
    %c0_i32_4 = arith.constant 0 : i32
    %14 = vector.broadcast %c0_i32_4 : i32 to vector<1x255xi32>
    %15 = arith.cmpi slt, %11, %14 : vector<1x255xi32>
    %c0_i32_5 = arith.constant 0 : i32
    %16 = arith.cmpi slt, %9, %c0_i32_5 : i32
    %17 = vector.broadcast %16 : i1 to vector<1x255xi1>
    %18 = vector.broadcast %17 : vector<1x255xi1> to vector<1x255xi1>
    %19 = arith.xori %15, %18 : vector<1x255xi1>
    %20 = arith.andi %19, %13 : vector<1x255xi1>
    %21 = vector.broadcast %9 : i32 to vector<1x255xi32>
    %22 = arith.addi %11, %21 : vector<1x255xi32>
    %23 = arith.select %20, %22, %11 : vector<1x255xi1>, vector<1x255xi32>
    %c15_i32 = arith.constant 15 : i32
    %24 = vector.broadcast %c15_i32 : i32 to vector<1x255xi32>
    %25 = arith.cmpi ne, %23, %24 : vector<1x255xi32>
    %26 = arith.mulf %6, %6 : vector<8x255xf32>
    %cst = arith.constant 0.000000e+00 : f32
    %27 = vector.shape_cast %25 : vector<1x255xi1> to vector<1x255xi1>
    %28 = vector.broadcast %27 : vector<1x255xi1> to vector<8x255xi1>
    %29 = vector.broadcast %cst : f32 to vector<8x255xf32>
    %30 = arith.select %28, %26, %29 : vector<8x255xi1>, vector<8x255xf32>
    %c0_6 = arith.constant 0 : index
    %c0_7 = arith.constant 0 : index
    %31 = vector.load %arg4[%c0_6, %c0_7] : memref<8x255xf32, #tpu.memory_space<vmem>>, vector<8x255xf32>
    %32 = arith.addf %31, %30 : vector<8x255xf32>
    %c0_8 = arith.constant 0 : index
    %c0_9 = arith.constant 0 : index
    %33 = vector.load %arg4[%c0_8, %c0_9] : memref<8x255xf32, #tpu.memory_space<vmem>>, vector<8x255xf32>
    tpu.vector_store %arg4[%c0_8, %c0_9], %32 {strides = array<i32>} : memref<8x255xf32, #tpu.memory_space<vmem>>, vector<8x255xf32>,
    %34 = vector.extract_strided_slice %3 {offsets = [0, 16], sizes = [8, 240], strides = [1, 1]} : vector<8x256xf32> to vector<8x240xf32>
    %35 = vector.extract_strided_slice %3 {offsets = [0, 0], sizes = [8, 240], strides = [1, 1]} : vector<8x256xf32> to vector<8x240xf32>
    %36 = arith.subf %34, %35 : vector<8x240xf32>
    %37 = arith.mulf %36, %36 : vector<8x240xf32>
    %c0_10 = arith.constant 0 : index
    %c0_11 = arith.constant 0 : index
    %38 = vector.load %arg5[%c0_10, %c0_11] : memref<8x240xf32, #tpu.memory_space<vmem>>, vector<8x240xf32>
    %39 = arith.addf %38, %37 : vector<8x240xf32>
    %c0_12 = arith.constant 0 : index
    %c0_13 = arith.constant 0 : index
    %40 = vector.load %arg5[%c0_12, %c0_13] : memref<8x240xf32, #tpu.memory_space<vmem>>, vector<8x240xf32>
    tpu.vector_store %arg5[%c0_12, %c0_13], %39 {strides = array<i32>} : memref<8x240xf32, #tpu.memory_space<vmem>>, vector<8x240xf32>,
    %c0_i32_14 = arith.constant 0 : i32
    %41 = arith.cmpi eq, %arg1, %c0_i32_14 : i32
    %42 = arith.extui %41 : i1 to i32
    %c0_i32_15 = arith.constant 0 : i32
    %43 = arith.cmpi ne, %42, %c0_i32_15 : i32
    scf.if %43 {
      %c0_16 = arith.constant 0 : index
      %c0_17 = arith.constant 0 : index
      %44 = vector.load %arg4[%c0_16, %c0_17] : memref<8x255xf32, #tpu.memory_space<vmem>>, vector<8x255xf32>
      %45 = vector.shape_cast %44 : vector<8x255xf32> to vector<1x8x255xf32>
      %cst_18 = arith.constant dense<0.000000e+00> : vector<1xf32>
      %46 = vector.multi_reduction <add>, %45, %cst_18 [1, 2] : vector<1x8x255xf32> to vector<1xf32>
      %47 = vector.shape_cast %46 : vector<1xf32> to vector<1x1x1xf32>
      %48 = vector.extract %47[0, 0, 0] : f32 from vector<1x1x1xf32>
      %c0_19 = arith.constant 0 : index
      %c0_20 = arith.constant 0 : index
      %49 = vector.load %arg5[%c0_19, %c0_20] : memref<8x240xf32, #tpu.memory_space<vmem>>, vector<8x240xf32>
      %50 = vector.shape_cast %49 : vector<8x240xf32> to vector<1x8x240xf32>
      %cst_21 = arith.constant dense<0.000000e+00> : vector<1xf32>
      %51 = vector.multi_reduction <add>, %50, %cst_21 [1, 2] : vector<1x8x240xf32> to vector<1xf32>
      %52 = vector.shape_cast %51 : vector<1xf32> to vector<1x1x1xf32>
      %53 = vector.extract %52[0, 0, 0] : f32 from vector<1x1x1xf32>
      %54 = arith.addf %48, %53 : f32
      %55 = vector.broadcast %54 : f32 to vector<1x8x128xf32>
      %c0_22 = arith.constant 0 : index
      %c0_23 = arith.constant 0 : index
      %c0_24 = arith.constant 0 : index
      %56 = vector.load %arg3[%c0_22, %c0_23, %c0_24] : memref<1x8x128xf32, #tpu.memory_space<vmem>>, vector<1x8x128xf32>
      tpu.vector_store %arg3[%c0_22, %c0_23, %c0_24], %55 {strides = array<i32>} : memref<1x8x128xf32, #tpu.memory_space<vmem>>, vector<1x8x128xf32>,
    } else {
    }
    return
  }
  func.func @transform_0(%arg0: i32, %arg1: i32) -> (i32, i32) {
    %c1_i32 = arith.constant 1 : i32
    %0 = arith.muli %arg0, %c1_i32 : i32
    %1 = arith.addi %0, %arg1 : i32
    %c0_i32 = arith.constant 0 : i32
    %2 = arith.minsi %1, %c0_i32 : i32
    %c0_i32_0 = arith.constant 0 : i32
    %c0_i32_1 = arith.constant 0 : i32
    return %2, %c0_i32_0 : i32, i32
  }
  func.func @transform_1(%arg0: i32, %arg1: i32) -> (i32, i32, i32) {
    %c0_i32 = arith.constant 0 : i32
    %c0_i32_0 = arith.constant 0 : i32
    %c0_i32_1 = arith.constant 0 : i32
    return %arg0, %c0_i32, %c0_i32_0 : i32, i32, i32
  }
}

</mosaic_0001>

<bundles_post_ra>
// kernel: tpu_custom_call.1
= control target key start
LH: loop header
LB: loop body
LE: loop exit
PB: predicated region body
PF: predicated region fallthrough
CT: control target
= control target key end

     0   :  { %6 = vsyncpa [#allocation5], 0  ;;  %s298_s0 = inlined_call_operand.hbm [shape: f32[8,256], index: 0, kind: input, shape index: {}]   ;;  %s299_s1 = inlined_call_operand.hbm [shape: f32[1,8,128], index: 1, kind: output, shape index: {}]  }
   0x1   :  { %7 = vsyncpa [#allocation6], 0  ;;  %s243_s6 = smov [#allocation4]   ;;  %s195_s10 = scalar_lea.hbm %s298_s0, 256 }
   0x2   :  { %s20_s7 = sshll.u32 %s243_s6, 4  ;;  %p196_p0 = scmp.ne.s32.totalorder %s298_s0, %s195_s10  ;;  %s21_s7 = int_to_ptr.vmem [resolvable:$true] %s20_s7 }
   0x3   :  { %p199_p1 = scmp.lt.u32.totalorder %s195_s10, %s298_s0 }
   0x5   :  { %p201_p2 = pnand %p199_p1, %p196_p0 }
   0x7   :  { %204 = shalt.err (!%p201_p2)
}
   0x8   :  { %s205_s15 = scalar_lea.vmem %s21_s7, 256  ;;  %p210_p4 = scmp.lt.s32.totalorder %s21_s7, %s21_s7 }
   0x9   :  { %p206_p3 = scmp.ne.s32.totalorder %s21_s7, %s205_s15  ;;  %p211_p5 = scmp.lt.s32.totalorder %s205_s15, %s205_s15 }
   0xb   :  { %p212_p6 = por %p211_p5, %p210_p4 }
   0xd   :  { %p213_p7 = pnand %p212_p6, %p206_p3 }
   0xf   :  { %216 = shalt.err (!%p213_p7)
}
  0x10   :  { %23 = dma.hbm_to_vmem [thread:$0]  %s298_s0, 256, %s21_s7, [#allocation5]  }
  0x11   :  { %239 = dma.done.wait [#allocation5], 256  }
  0x12   :  { %240 = vsyncadd [#allocation5], 4294967040  ;;  %v40_v0 = vld [vmem:[#allocation4] sm:$0xff]  ;;  %s244_s18 = smov 16   ;;  %s245_s19 = smov 1   ;;  %v41_v1 = vld [vmem:[#allocation4 + $0x8] sm:$0xff]  ;;  %v54_v17 = vlaneseq }
  0x13   :  { %107 = vrot.lane.b32.xlu1 %v40_v0, %s244_s18  ;;  %44 = vrot.lane.b32.xlu0 %v40_v0, %s245_s19  ;;  %vm35_vm0 = vcmask 1039360   ;;  %v246_v2 = vmov 0.0   ;;  %vm38_vm1 = vcmask 916480   ;;  %vm111_vm2 = vcmask 130048   ;;  %s247_s0 = smov 127   ;;  %s248_s20 = smov 112  }
  0x14   :  { %36 = vst.msk [vmem:[#allocation2 + $0x8] sm:$0xff] %vm35_vm0, %v246_v2  ;;  %vm48_vm3 = vcmask 7168   ;;  %v55_v18 = vand.u32 127, %v54_v17  ;;  %s249_s22 = smov [#allocation7]  }
  0x15   :  { %39 = vst.msk [vmem:[#allocation3 + $0x8] sm:$0xff] %vm38_vm1, %v246_v2  ;;  %s173_s23 = sshll.u32 %s249_s22, 4  ;;  %s174_s23 = int_to_ptr.vmem [resolvable:$true] %s173_s23 }
  0x16   :  { %v56_v19 = vadd.s32 128, %v55_v18  ;;  %v61_v21 = vand.u32 15, %v55_v18  ;;  %s217_s26 = scalar_lea.vmem %s174_s23, 128  ;;  %p222_p9 = scmp.lt.s32.totalorder %s174_s23, %s174_s23 }
  0x17   :  { %109 = vrot.lane.b32.xlu1 %v41_v1, %s244_s18  ;;  %46 = vrot.lane.b32.xlu0 %v41_v1, %s245_s19  ;;  %p218_p8 = scmp.ne.s32.totalorder %s174_s23, %s217_s26  ;;  %p223_p10 = scmp.lt.s32.totalorder %s217_s26, %s217_s26 }
  0x18   :  { %v68_v20 = vand.u32 15, %v56_v19  ;;  %vm274_vm5 = vcmp.ne.s32.totalorder %v61_v21, 15 }
  0x19   :  { %p224_p11 = por %p223_p10, %p222_p9 }
  0x1a   :  { %vm82_vm4 = vcmp.ne.s32.totalorder %v68_v20, 15 }
  0x1b   :  { %v102_v24 = vld [vmem:[#allocation2 + $0x8] sm:$0xff]  ;;  %p225_p12 = pnand %p224_p11, %p218_p8 }
  0x1c   :  { %v120_v30 = vld [vmem:[#allocation3 + $0x8] sm:$0xff] }
  0x85   :  { %v108_v3 = vpop.permute.xlu1 %107  ;;  %v45_v4 = vpop.permute.xlu0 %44 }
  0x86   :  { %v115_v5 = vsub.f32 %v40_v0, %v108_v3  ;;  %v52_v6 = vsub.f32 %v40_v0, %v45_v4 }
  0x88   :  { %v83_v7 = vmul.f32 %v52_v6, %v52_v6  ;;  %v117_v10 = vmul.f32 %v115_v5, %v115_v5 }
  0x89   :  { %v110_v8 = vpop.permute.xlu1 %109  ;;  %v47_v9 = vpop.permute.xlu0 %46 }
  0x8a   :  { %v112_v11 = vsel %vm111_vm2, %v108_v3, %v110_v8  ;;  %v49_v12 = vsel %vm48_vm3, %v45_v4, %v47_v9  ;;  %91 = vrot.lane.b32.xlu0 %v83_v7, %s247_s0 }
  0x8b   :  { %v53_v13 = vsub.f32 %v41_v1, %v49_v12  ;;  %v116_v14 = vsub.f32 %v41_v1, %v112_v11 }
  0x8d   :  { %v84_v15 = vmul.f32 %v53_v13, %v53_v13  ;;  %v118_v16 = vmul.f32 %v116_v14, %v116_v14 }
  0x8e   :  { %123 = vrot.lane.b32.xlu0 %v117_v10, %s248_s20 }
  0x8f   :  { %93 = vrot.lane.b32.xlu1 %v84_v15, %s247_s0 }
  0x93   :  { %125 = vrot.lane.b32.xlu1 %v118_v16, %s248_s20 }
  0xfc   :  { %v92_v22 = vpop.permute.xlu0 %91 }
 0x100   :  { %v124_v31 = vpop.permute.xlu0 %123 }
 0x101   :  { %v94_v25 = vpop.permute.xlu1 %93 }
 0x102   :  { %v96_v26 = vsel %vm35_vm0, %v92_v22, %v94_v25  ;;  %v100_v27 = vsel %vm82_vm4, %v94_v25, 0.0 }
 0x103   :  { %v99_v28 = vsel %vm274_vm5, %v96_v26, 0.0  ;;  %v104_v29 = vadd.f32 %v102_v24, %v100_v27 }
 0x105   :  { %106 = vst.msk [vmem:[#allocation2 + $0x8] sm:$0xff] %vm35_vm0, %v104_v29  ;;  %v126_v32 = vpop.permute.xlu1 %125 }
 0x106   :  { %v128_v33 = vsel %vm38_vm1, %v124_v31, %v126_v32  ;;  %v132_v34 = vadd.f32 %v126_v32, %v120_v30 }
 0x108   :  { %134 = vst.msk [vmem:[#allocation3 + $0x8] sm:$0xff] %vm38_vm1, %v132_v34 }
 0x10c   :  { %v139_v35 = vld [vmem:[#allocation2 + $0x8] sm:$0xff] }
 0x10d   :  { %v140_v36 = vsel %vm35_vm0, %v139_v35, 0.0 }
 0x10e   :  { %v141_v37 = vadd.f32 %v140_v36, %v99_v28 }
 0x10f   :  { %v152_v38 = vld [vmem:[#allocation3 + $0x8] sm:$0xff] }
 0x110   :  { %142 = vadd.xlane.f32.xlu0 %v141_v37  ;;  %v153_v39 = vsel %vm38_vm1, %v152_v38, 0.0 }
 0x111   :  { %v154_v40 = vadd.f32 %v153_v39, %v128_v33 }
 0x113   :  { %155 = vadd.xlane.f32.xlu1 %v154_v40 }
 0x19d   :  { %v143_v41 = vpop.xlane.xlu0 %142 }
 0x19e   :  { %v144_v42 = vrot.slane %v143_v41, 4 }
 0x1a0   :  { %v145_v43 = vadd.f32 %v144_v42, %v143_v41  ;;  %v156_v44 = vpop.xlane.xlu1 %155 }
 0x1a1   :  { %v157_v45 = vrot.slane %v156_v44, 4 }
 0x1a2   :  { %v146_v46 = vrot.slane %v145_v43, 2 }
 0x1a3   :  { %v158_v47 = vadd.f32 %v157_v45, %v156_v44 }
 0x1a4   :  { %v147_v48 = vadd.f32 %v146_v46, %v145_v43 }
 0x1a5   :  { %v159_v49 = vrot.slane %v158_v47, 2 }
 0x1a6   :  { %v148_v50 = vrot.slane %v147_v48, 1 }
 0x1a7   :  { %v160_v51 = vadd.f32 %v159_v49, %v158_v47 }
 0x1a8   :  { %v149_v52 = vadd.f32 %v148_v50, %v147_v48 }
 0x1a9   :  { %v161_v53 = vrot.slane %v160_v51, 1 }
 0x1aa   :  { %184 = vpush %v149_v52 }
 0x1ab   :  { %v162_v54 = vadd.f32 %v161_v53, %v160_v51 }
 0x1ad   :  { %186 = vpush %v162_v54 }
 0x1db   :  { %s185_s21 = spop %184 }
 0x1de   :  { %s187_s24 = spop %186 }
 0x1df   :  { %s164_s25 = sadd.f32 %s187_s24, %s185_s21 }
 0x1e1   :  { %v165_v55 = vstv %s164_s25 }
 0x1e2   :  { %166 = vst [vmem:[#allocation7] sm:$0xff] %v165_v55 }
 0x1e3   :  { %228 = shalt.err (!%p225_p12)
}
 0x1e4   :  { %s229_s29 = scalar_lea.hbm %s299_s1, 128 }
 0x1e5   :  { %p230_p13 = scmp.ne.s32.totalorder %s299_s1, %s229_s29  ;;  %p233_p0 = scmp.lt.u32.totalorder %s229_s29, %s299_s1 }
 0x1e7   :  { %p235_p1 = pnand %p233_p0, %p230_p13 }
 0x1e9   :  { %238 = shalt.err (!%p235_p1)
}
 0x1ea   :  { %176 = dma.vmem_to_hbm [thread:$0]  %s174_s23, 128, %s299_s1, [#allocation6]  }
 0x1eb   :  { %241 = dma.done.wait [#allocation6], 128  }
 0x1ec   :  { %242 = vsyncadd [#allocation6], 4294967168 }
 0x1ed   :  { %180 = vsyncpa [#allocation5], 1 }
 0x1ee   :  { %181 = vsyncpa [#allocation6], 1 }

</bundles_post_ra>
